<compile_context>
chip_gen: v5e
topology: v5e:2x2
jax: 0.10.0
libtpu: 0.0.40
codegen_flags: <defaults>
</compile_context>

<pallas_src>
import functools

import jax
import jax.numpy as jnp
from jax import lax
from jax.experimental import pallas as pl
from jax.experimental.pallas import tpu as pltpu


# ---------------------------------------------------------------------------
# Small host-side helpers.
# ---------------------------------------------------------------------------
def _round_up(x, m):
    return (x + m - 1) // m * m


def _pick_batch_group(btot, mp_pad, tm_max):
    """How many batch elements share one lane block.

    Pick the largest divisor G of btot with G * mp_pad <= tm_max, then back off to
    keep >= 2 grid steps so both v7x TensorCores get work (no effect on v5e/v6e).
    """
    best = 1
    for g in range(1, btot + 1):
        if btot % g == 0 and g * mp_pad <= tm_max:
            best = g
    if best == btot and btot >= 2:
        for g in range(btot - 1, 0, -1):
            if btot % g == 0:
                best = g
                break
    # TODO(synk): if a single padded image exceeds tm_max (e.g. 640x640 inputs), add
    #             halo'd lane sub-tiling; at the shapes used here mp_pad << tm_max.
    return best


# ---------------------------------------------------------------------------
# Fused Pallas conv kernel: in-kernel im2col via per-tap lane-offset accumulation.
#
#   o[:, q] = act( sum_t  W[t] @ x[:, q + off_t]  + b )
#
# x is the *padded* image flattened per batch chunk (chunk stride mp_pad), so every
# kernel tap is a constant lane offset and all reads for valid output positions stay
# inside their own batch chunk.  Junk lanes (pad columns / rows / lane padding) are
# computed but sliced away on the XLA side.
# ---------------------------------------------------------------------------
def _conv_taps_kernel(w_ref, b_ref, x_ref, o_ref, *, tap_offsets, width, relu):
    # w_ref: (T, Cout, Cin)   b_ref: (Cout, 1) f32
    # x_ref: (Cin, TM)        o_ref: (Cout, TM)
    xb = x_ref[...]
    cout = o_ref.shape[0]
    acc = jnp.zeros((cout, width), jnp.float32)
    for t, off in enumerate(tap_offsets):            # static unroll over KH*KW taps
        acc = acc + jnp.dot(w_ref[t], xb[:, off:off + width],
                            preferred_element_type=jnp.float32)
    acc = acc + b_ref[...]                            # (Cout, 1) broadcasts over lanes
    if relu:
        acc = jnp.maximum(acc, 0.0)
    o_ref[:, :width] = acc.astype(o_ref.dtype)
    if width < o_ref.shape[1]:                        # deterministic junk tail
        o_ref[:, width:] = jnp.zeros((cout, o_ref.shape[1] - width), o_ref.dtype)


def conv2d_cf(x, w, b, padding, relu=False, *, compute_dtype=jnp.bfloat16,
              out_dtype=None, tm_max=4096):
    """Channels-first conv.  x: (Cin, B, H, W);  w: (Cout, Cin, KH, KW) torch OIHW;
    b: (Cout,).  Returns (Cout, B, Hout, Wout) in out_dtype (default compute_dtype)."""
    if out_dtype is None:
        out_dtype = compute_dtype
    Cin, B, H, W = x.shape
    Cout, _, KH, KW = w.shape
    Hp, Wp = H + 2 * padding, W + 2 * padding
    Hout, Wout = Hp - KH + 1, Wp - KW + 1
    Mp = Hp * Wp
    mp_pad = _round_up(max(Mp, 128), 128)             # lane chunk per batch element
    G = _pick_batch_group(B, mp_pad, tm_max)
    tm = G * mp_pad                                   # lane tile (multiple of 128)
    off_max = (KH - 1) * Wp + (KW - 1)
    width = tm - off_max                              # covers every valid output lane

    # Pad + flatten on the XLA side (1x activation traffic, already in bf16).
    xp = x.astype(compute_dtype)
    if padding:
        xp = jnp.pad(xp, ((0, 0), (0, 0), (padding, padding), (padding, padding)))
    xf = xp.reshape(Cin, B, Mp)
    if mp_pad != Mp:
        xf = jnp.pad(xf, ((0, 0), (0, 0), (0, mp_pad - Mp)))
    xf = xf.reshape(Cin, B * mp_pad)

    wt = jnp.transpose(w, (2, 3, 0, 1)).reshape(KH * KW, Cout, Cin).astype(compute_dtype)
    bcol = b.reshape(Cout, 1).astype(jnp.float32)
    tap_offsets = tuple(kh * Wp + kw for kh in range(KH) for kw in range(KW))

    # VMEM budget derived from the actual tile bytes (double-buffered in/out + acc),
    # instead of a flat cap; stays far below 64 MiB/TC on v7x at these shapes.
    in_b = jnp.dtype(compute_dtype).itemsize
    out_b = jnp.dtype(out_dtype).itemsize
    est = (2 * tm * (Cin * in_b + Cout * out_b) + KH * KW * Cout * Cin * in_b
           + 4 * Cout * tm + (2 << 20))
    vmem_limit = int(min(48 * 2 ** 20, max(16 * 2 ** 20, 2 * est)))

    kernel = functools.partial(_conv_taps_kernel, tap_offsets=tap_offsets,
                               width=width, relu=relu)
    y = pl.pallas_call(
        kernel,
        out_shape=jax.ShapeDtypeStruct((Cout, B * mp_pad), out_dtype),
        grid=(B // G,),
        in_specs=[
            # Constant block index -> weight / bias DMA is not re-issued per step.
            pl.BlockSpec((KH * KW, Cout, Cin), lambda i: (0, 0, 0)),
            pl.BlockSpec((Cout, 1), lambda i: (0, 0)),
            pl.BlockSpec((Cin, tm), lambda i: (0, i)),
        ],
        out_specs=pl.BlockSpec((Cout, tm), lambda i: (0, i)),
        compiler_params=pltpu.CompilerParams(
            dimension_semantics=("parallel",),
            vmem_limit_bytes=vmem_limit,
        ),
    )(wt, bcol, xf)

    # Drop lane padding + padded-grid junk (valid outputs live at flat i*Wp + j).
    y = y.reshape(Cout, B, mp_pad)[:, :, :Mp].reshape(Cout, B, Hp, Wp)
    return y[:, :, :Hout, :Wout]


def conv_transpose2x2_cf(x, w, b, *, compute_dtype=jnp.bfloat16, tm_max=4096):
    """torch ConvTranspose2d(Cin, Cout, kernel_size=2, stride=2).
    x: (Cin, B, H, W); w: (Cin, Cout, 2, 2) (torch layout); b: (Cout,)."""
    Cin, B, H, W = x.shape
    Cout = w.shape[1]
    # Each 2x2 output block depends on one input pixel -> a 1x1 conv to 4*Cout
    # channels (rows ordered (dy, dx, co)) through the fused Pallas kernel.
    w1 = jnp.transpose(w, (2, 3, 1, 0)).reshape(4 * Cout, Cin, 1, 1)
    b4 = jnp.tile(b, 4)
    y = conv2d_cf(x, w1, b4, padding=0, relu=False,
                  compute_dtype=compute_dtype, out_dtype=compute_dtype, tm_max=tm_max)
    # TODO(synk): fold this 2x upsample interleave into the next conv's tap indexing
    #             (or a strided-store Pallas epilogue) to avoid the XLA transpose.
    y = y.reshape(2, 2, Cout, B, H, W)
    y = jnp.transpose(y, (2, 3, 4, 0, 5, 1)).reshape(Cout, B, 2 * H, 2 * W)
    return y


def maxpool2_cf(x):
    # 2x2 / stride-2 max pooling (data-movement glue; conv matmuls dominate FLOPs).
    C, B, H, W = x.shape
    return jnp.max(x.reshape(C, B, H // 2, 2, W // 2, 2), axis=(3, 5))


# ---------------------------------------------------------------------------
# UNet sub-modules (weights shared across subdomains, exactly as the PyTorch module
# deep-copies one encoder / decoder onto every device).  Activations are (C, B, H, W).
# ---------------------------------------------------------------------------
def conv_block_forward(params, x, padding, cd, tm):
    # TODO(synk): fuse the num_convs convs of a block into one pallas_call (second
    #             tap-accumulation consuming the first's VMEM tile) to drop one HBM
    #             round trip of the intermediate activation.
    for p in params:
        x = conv2d_cf(x, p["w"], p["b"], padding, relu=True,
                      compute_dtype=cd, tm_max=tm)
    return x


def encoder_forward(params, x, padding, cd, tm):
    feats = [conv_block_forward(params["inc"], x, padding, cd, tm)]
    for blk in params["downs"]:
        feats.append(conv_block_forward(blk, maxpool2_cf(feats[-1]), padding, cd, tm))
    return feats


def decoder_forward(params, feats, padding, cd, tm):
    x = feats[-1]
    for lvl, up in enumerate(params["ups"]):
        x = conv_transpose2x2_cf(x, up["wt"], up["bt"], compute_dtype=cd, tm_max=tm)
        skip = feats[-2 - lvl]
        x = jnp.concatenate([skip, x], axis=0)               # channel concat (C first)
        x = conv_block_forward(up["block"], x, padding, cd, tm)
    return conv2d_cf(x, params["outc"]["w"], params["outc"]["b"], padding=0,
                     relu=False, compute_dtype=cd, out_dtype=jnp.float32, tm_max=tm)


def communicator_forward(params, x, padding, cd, tm):
    x = conv2d_cf(x, params[0]["w"], params[0]["b"], padding, relu=True,
                  compute_dtype=cd, tm_max=tm)
    x = conv2d_cf(x, params[1]["w"], params[1]["b"], padding, relu=False,
                  compute_dtype=cd, tm_max=tm)
    return x


# ---------------------------------------------------------------------------
# Subdomain stitching — literal mirror of concatenate_tensors /
# _split_concatenated_tensor from the PyTorch module.  In the (C, B, H, W) layout the
# spatial axes are 2 and 3, exactly as in torch's NCHW, so the same index math holds.
# ---------------------------------------------------------------------------
def concatenate_tensors(tensors, nx, ny):
    rows = []
    for i in range(nx):
        cols = [tensors[i * ny + j] for j in range(ny)]
        rows.append(jnp.concatenate(cols, axis=2))           # torch dim 2
    return jnp.concatenate(rows, axis=3)                     # torch dim 3


def split_concatenated(t, nx, ny):
    # NOTE: keeps the original module's height/width index quirk (shape[3]//nx sliced
    # on axis 2, shape[2]//ny on axis 3); exact for square subdomains / nx == ny.
    subdomain_height = t.shape[3] // nx
    subdomain_width = t.shape[2] // ny
    subs = []
    for i in range(nx):
        for j in range(ny):
            subs.append(t[:, :,
                          j * subdomain_height:(j + 1) * subdomain_height,
                          i * subdomain_width:(i + 1) * subdomain_width])
    return subs


# ---------------------------------------------------------------------------
# MultiGPU_UNet_with_comm forward (single TPU; device placement is a no-op).
# ---------------------------------------------------------------------------
def ddu_net_forward(params, input_image_list, cfg):
    nx, ny = cfg["nx"], cfg["ny"]
    nf = cfg["num_comm_fmaps"]
    padding = cfg["padding"]
    cd, tm = cfg["compute_dtype"], cfg["tm_max"]
    n_sub = nx * ny
    assert len(input_image_list) == n_sub

    # Weights are shared across subdomains -> fold subdomains into the batch and carry
    # activations channels-first in bf16 so the flattened spatial axis sits on lanes.
    B = input_image_list[0].shape[0]
    x = jnp.concatenate(input_image_list, axis=0)             # (n_sub*B, C, H, W)
    x = jnp.transpose(x, (1, 0, 2, 3)).astype(cd)             # (C, n_sub*B, H, W)

    feats = encoder_forward(params["encoder"], x, padding, cd, tm)

    if cfg["comm"]:
        bott = feats[-1]                                      # (Cb, n_sub*B, Hb, Wb)
        Cb = bott.shape[0]
        comm_slices = [bott[Cb - nf:, s * B:(s + 1) * B] for s in range(n_sub)]
        if not cfg["comm_network_but_no_communication"]:
            comm_in = concatenate_tensors(comm_slices, nx, ny)
            comm_out = communicator_forward(params["comm"], comm_in, padding, cd, tm)
            new_tail = jnp.concatenate(split_concatenated(comm_out, nx, ny), axis=1)
        else:
            comm_in = jnp.concatenate(comm_slices, axis=1)    # batched, no exchange
            new_tail = communicator_forward(params["comm"], comm_in, padding, cd, tm)
        feats[-1] = jnp.concatenate([bott[:Cb - nf], new_tail.astype(cd)], axis=0)

    y = decoder_forward(params["decoder"], feats, padding, cd, tm)  # (ncls, n_sub*B, H, W)
    outs = [y[:, s * B:(s + 1) * B] for s in range(n_sub)]
    pred = concatenate_tensors(outs, nx, ny)                  # (ncls, B, ny*H, nx*W)
    return jnp.transpose(pred, (1, 0, 2, 3))                  # NCHW


# ---------------------------------------------------------------------------
# Deterministic parameter construction (torch weight layouts: OIHW conv,
# (Cin, Cout, 2, 2) transposed conv).
# ---------------------------------------------------------------------------
def _conv_params(key, cout, cin, kh, kw):
    k1, k2 = jax.random.split(key)
    scale = 1.0 / jnp.sqrt(jnp.float32(kh * kw * cin))
    w = jax.random.normal(k1, (cout, cin, kh, kw), jnp.float32) * scale
    b = jax.random.normal(k2, (cout,), jnp.float32) * 0.01
    return {"w": w, "b": b}


def _conv_block_params(key, cin, cout, k, num_convs):
    params = []
    for i in range(num_convs):
        key, sub = jax.random.split(key)
        params.append(_conv_params(sub, cout, cin if i == 0 else cout, k, k))
    return params, key


def make_params(key, cfg):
    k = cfg["kernel_size"]
    c = cfg["complexity"]
    depth = cfg["depth"]
    nconv = cfg["num_convs"]

    # Encoder
    inc, key = _conv_block_params(key, cfg["n_channels"], c, k, nconv)
    downs = []
    for i in range(depth):
        blk, key = _conv_block_params(key, c * 2 ** i, c * 2 ** (i + 1), k, nconv)
        downs.append(blk)
    encoder = {"inc": inc, "downs": downs}

    # Decoder
    ups = []
    for i in reversed(range(depth)):
        cin, cout = c * 2 ** (i + 1), c * 2 ** i
        key, kw_, kb_ = jax.random.split(key, 3)
        wt = jax.random.normal(kw_, (cin, cout, 2, 2), jnp.float32) / jnp.sqrt(
            jnp.float32(4 * cin))
        bt = jax.random.normal(kb_, (cout,), jnp.float32) * 0.01
        blk, key = _conv_block_params(key, cin, cout, k, nconv)
        ups.append({"wt": wt, "bt": bt, "block": blk})
    key, ko = jax.random.split(key)
    outc = _conv_params(ko, cfg["n_classes"], c, 1, 1)
    decoder = {"ups": ups, "outc": outc}

    # Communication network
    nf = cfg["num_comm_fmaps"]
    key, kc1, kc2 = jax.random.split(key, 3)
    comm = [_conv_params(kc1, 2 * nf, nf, k, k), _conv_params(kc2, nf, 2 * nf, k, k)]

    return {"encoder": encoder, "decoder": decoder, "comm": comm}


# ---------------------------------------------------------------------------
# Reference conv for the self-check.
# ---------------------------------------------------------------------------
def _conv_ref_nchw(x, w, b, padding):
    y = lax.conv_general_dilated(
        x, w, window_strides=(1, 1), padding=[(padding, padding)] * 2,
        dimension_numbers=("NCHW", "OIHW", "NCHW"),
        precision=lax.Precision.HIGHEST)
    return y + b[None, :, None, None]


def _conv_pallas_nchw(x, w, b, padding, compute_dtype, tm_max):
    xc = jnp.transpose(x, (1, 0, 2, 3))
    y = conv2d_cf(xc, w, b, padding, relu=False, compute_dtype=compute_dtype,
                  out_dtype=jnp.float32, tm_max=tm_max)
    return jnp.transpose(y, (1, 0, 2, 3))


if __name__ == "__main__":
    settings = {
        "model": {
            "kernel_size": 3,
            "padding": None,                       # -> kernel_size // 2 = 1
            "dropout_rate": 0.0,                   # identity at inference
            "UNet": {"num_channels": 4, "num_outputs": 2, "depth": 2,
                     "complexity": 4, "num_convs": 2},
            "comm": {"num_comm_fmaps": 8, "comm": True},
        },
        "data": {"subdomains_dist": (2, 2)},
        "comm": {"exchange_fmaps": True},
    }
    cfg = {
        "kernel_size": settings["model"]["kernel_size"],
        "padding": settings["model"]["kernel_size"] // 2,
        "n_channels": settings["model"]["UNet"]["num_channels"],
        "n_classes": settings["model"]["UNet"]["num_outputs"],
        "depth": settings["model"]["UNet"]["depth"],
        "complexity": settings["model"]["UNet"]["complexity"],
        "num_convs": settings["model"]["UNet"]["num_convs"],
        "num_comm_fmaps": settings["model"]["comm"]["num_comm_fmaps"],
        "comm": settings["model"]["comm"]["comm"],
        "comm_network_but_no_communication": not settings["comm"]["exchange_fmaps"],
        "nx": settings["data"]["subdomains_dist"][0],
        "ny": settings["data"]["subdomains_dist"][1],
        # bf16 operands pay off on v5e/v6e/v7x alike (f32 MXU accumulation); the tile
        # budget is derived per-call from actual bytes, so one tm cap fits all gens.
        "compute_dtype": jnp.bfloat16,
        "tm_max": 4096,
    }

    key = jax.random.PRNGKey(0)
    key, kp = jax.random.split(key)
    params = make_params(kp, cfg)

    # --- self-check: fused tap-accumulation conv vs XLA reference (f32 and bf16) ---
    kx, kw_ = jax.random.split(jax.random.PRNGKey(1))
    x_chk = jax.random.normal(kx, (2, 4, 16, 16), jnp.float32)
    p_chk = _conv_params(kw_, 8, 4, 3, 3)
    y_ref = _conv_ref_nchw(x_chk, p_chk["w"], p_chk["b"], padding=1)
    y_f32 = jax.block_until_ready(
        _conv_pallas_nchw(x_chk, p_chk["w"], p_chk["b"], 1, jnp.float32,
                          cfg["tm_max"]))
    assert jnp.allclose(y_f32, y_ref, atol=1e-3, rtol=1e-3)
    y_bf16 = jax.block_until_ready(
        _conv_pallas_nchw(x_chk, p_chk["w"], p_chk["b"], 1, jnp.bfloat16,
                          cfg["tm_max"]))
    assert jnp.allclose(y_bf16, y_ref, atol=5e-2, rtol=5e-2)

    # --- full forward ---
    B, Cin, H, W = 2, cfg["n_channels"], 16, 16
    n_sub = cfg["nx"] * cfg["ny"]
    input_keys = jax.random.split(key, n_sub)
    input_image_list = [jax.random.normal(input_keys[s], (B, Cin, H, W), jnp.float32)
                        for s in range(n_sub)]

    fwd = jax.jit(functools.partial(ddu_net_forward, cfg=cfg))
    prediction = fwd(params, input_image_list)
    prediction = jax.block_until_ready(prediction)

    expected = (B, cfg["n_classes"], cfg["ny"] * H, cfg["nx"] * W)
    assert prediction.shape == expected, (prediction.shape, expected)
    assert bool(jnp.all(jnp.isfinite(prediction)))
    print("KERNEL_OK")
</pallas_src>

<mosaic_0001>
module attributes {stable_mosaic.version = 11 : i64} {
  func.func @_conv_taps_kernel(%arg0: i32, %arg1: memref<9x8x4xf32, #tpu.memory_space<vmem>>, %arg2: memref<8x1xf32, #tpu.memory_space<vmem>>, %arg3: memref<4x384xf32, #tpu.memory_space<vmem>>, %arg4: memref<8x384xf32, #tpu.memory_space<vmem>>) attributes {dimension_semantics = [#tpu.dimension_semantics<parallel>], iteration_bounds = array<i64: 2>, scalar_prefetch = 0 : i64, scratch_operands = 0 : i64, tpu.core_type = #tpu.core_type<tc>, window_params = [{pipeline_mode = #tpu.pipeline_mode<synchronous>, transform_indices = @transform_0, window_bounds = array<i64: 9, 8, 4>}, {pipeline_mode = #tpu.pipeline_mode<synchronous>, transform_indices = @transform_1, window_bounds = array<i64: 8, 1>}, {transform_indices = @transform_2, window_bounds = array<i64: 4, 384>}, {transform_indices = @transform_3, window_bounds = array<i64: 8, 384>}]} {
    %c0 = arith.constant 0 : index
    %c0_0 = arith.constant 0 : index
    %0 = vector.load %arg3[%c0, %c0_0] : memref<4x384xf32, #tpu.memory_space<vmem>>, vector<4x384xf32>
    %cst = arith.constant 0.000000e+00 : f32
    %1 = vector.broadcast %cst : f32 to vector<8x346xf32>
    %c0_1 = arith.constant 0 : index
    %c0_2 = arith.constant 0 : index
    %c0_3 = arith.constant 0 : index
    %2 = vector.load %arg1[%c0_1, %c0_2, %c0_3] : memref<9x8x4xf32, #tpu.memory_space<vmem>>, vector<1x8x4xf32>
    %3 = vector.shape_cast %2 : vector<1x8x4xf32> to vector<8x4xf32>
    %4 = vector.extract_strided_slice %0 {offsets = [0, 0], sizes = [4, 346], strides = [1, 1]} : vector<4x384xf32> to vector<4x346xf32>
    %cst_4 = arith.constant dense<0.000000e+00> : vector<8x346xf32>
    %5 = tpu.matmul %3, %4, %cst_4 {dimension_numbers = #tpu.dot_dimension_numbers<[1], [0], [0], [1], [0, 0, 1, 1], [], []>} : vector<8x4xf32>, vector<4x346xf32>, vector<8x346xf32> -> vector<8x346xf32>
    %6 = arith.addf %1, %5 : vector<8x346xf32>
    %c1 = arith.constant 1 : index
    %c0_5 = arith.constant 0 : index
    %c0_6 = arith.constant 0 : index
    %7 = vector.load %arg1[%c1, %c0_5, %c0_6] : memref<9x8x4xf32, #tpu.memory_space<vmem>>, vector<1x8x4xf32>
    %8 = vector.shape_cast %7 : vector<1x8x4xf32> to vector<8x4xf32>
    %9 = vector.extract_strided_slice %0 {offsets = [0, 1], sizes = [4, 346], strides = [1, 1]} : vector<4x384xf32> to vector<4x346xf32>
    %cst_7 = arith.constant dense<0.000000e+00> : vector<8x346xf32>
    %10 = tpu.matmul %8, %9, %cst_7 {dimension_numbers = #tpu.dot_dimension_numbers<[1], [0], [0], [1], [0, 0, 1, 1], [], []>} : vector<8x4xf32>, vector<4x346xf32>, vector<8x346xf32> -> vector<8x346xf32>
    %11 = arith.addf %6, %10 : vector<8x346xf32>
    %c2 = arith.constant 2 : index
    %c0_8 = arith.constant 0 : index
    %c0_9 = arith.constant 0 : index
    %12 = vector.load %arg1[%c2, %c0_8, %c0_9] : memref<9x8x4xf32, #tpu.memory_space<vmem>>, vector<1x8x4xf32>
    %13 = vector.shape_cast %12 : vector<1x8x4xf32> to vector<8x4xf32>
    %14 = vector.extract_strided_slice %0 {offsets = [0, 2], sizes = [4, 346], strides = [1, 1]} : vector<4x384xf32> to vector<4x346xf32>
    %cst_10 = arith.constant dense<0.000000e+00> : vector<8x346xf32>
    %15 = tpu.matmul %13, %14, %cst_10 {dimension_numbers = #tpu.dot_dimension_numbers<[1], [0], [0], [1], [0, 0, 1, 1], [], []>} : vector<8x4xf32>, vector<4x346xf32>, vector<8x346xf32> -> vector<8x346xf32>
    %16 = arith.addf %11, %15 : vector<8x346xf32>
    %c3 = arith.constant 3 : index
    %c0_11 = arith.constant 0 : index
    %c0_12 = arith.constant 0 : index
    %17 = vector.load %arg1[%c3, %c0_11, %c0_12] : memref<9x8x4xf32, #tpu.memory_space<vmem>>, vector<1x8x4xf32>
    %18 = vector.shape_cast %17 : vector<1x8x4xf32> to vector<8x4xf32>
    %19 = vector.extract_strided_slice %0 {offsets = [0, 18], sizes = [4, 346], strides = [1, 1]} : vector<4x384xf32> to vector<4x346xf32>
    %cst_13 = arith.constant dense<0.000000e+00> : vector<8x346xf32>
    %20 = tpu.matmul %18, %19, %cst_13 {dimension_numbers = #tpu.dot_dimension_numbers<[1], [0], [0], [1], [0, 0, 1, 1], [], []>} : vector<8x4xf32>, vector<4x346xf32>, vector<8x346xf32> -> vector<8x346xf32>
    %21 = arith.addf %16, %20 : vector<8x346xf32>
    %c4 = arith.constant 4 : index
    %c0_14 = arith.constant 0 : index
    %c0_15 = arith.constant 0 : index
    %22 = vector.load %arg1[%c4, %c0_14, %c0_15] : memref<9x8x4xf32, #tpu.memory_space<vmem>>, vector<1x8x4xf32>
    %23 = vector.shape_cast %22 : vector<1x8x4xf32> to vector<8x4xf32>
    %24 = vector.extract_strided_slice %0 {offsets = [0, 19], sizes = [4, 346], strides = [1, 1]} : vector<4x384xf32> to vector<4x346xf32>
    %cst_16 = arith.constant dense<0.000000e+00> : vector<8x346xf32>
    %25 = tpu.matmul %23, %24, %cst_16 {dimension_numbers = #tpu.dot_dimension_numbers<[1], [0], [0], [1], [0, 0, 1, 1], [], []>} : vector<8x4xf32>, vector<4x346xf32>, vector<8x346xf32> -> vector<8x346xf32>
    %26 = arith.addf %21, %25 : vector<8x346xf32>
    %c5 = arith.constant 5 : index
    %c0_17 = arith.constant 0 : index
    %c0_18 = arith.constant 0 : index
    %27 = vector.load %arg1[%c5, %c0_17, %c0_18] : memref<9x8x4xf32, #tpu.memory_space<vmem>>, vector<1x8x4xf32>
    %28 = vector.shape_cast %27 : vector<1x8x4xf32> to vector<8x4xf32>
    %29 = vector.extract_strided_slice %0 {offsets = [0, 20], sizes = [4, 346], strides = [1, 1]} : vector<4x384xf32> to vector<4x346xf32>
    %cst_19 = arith.constant dense<0.000000e+00> : vector<8x346xf32>
    %30 = tpu.matmul %28, %29, %cst_19 {dimension_numbers = #tpu.dot_dimension_numbers<[1], [0], [0], [1], [0, 0, 1, 1], [], []>} : vector<8x4xf32>, vector<4x346xf32>, vector<8x346xf32> -> vector<8x346xf32>
    %31 = arith.addf %26, %30 : vector<8x346xf32>
    %c6 = arith.constant 6 : index
    %c0_20 = arith.constant 0 : index
    %c0_21 = arith.constant 0 : index
    %32 = vector.load %arg1[%c6, %c0_20, %c0_21] : memref<9x8x4xf32, #tpu.memory_space<vmem>>, vector<1x8x4xf32>
    %33 = vector.shape_cast %32 : vector<1x8x4xf32> to vector<8x4xf32>
    %34 = vector.extract_strided_slice %0 {offsets = [0, 36], sizes = [4, 346], strides = [1, 1]} : vector<4x384xf32> to vector<4x346xf32>
    %cst_22 = arith.constant dense<0.000000e+00> : vector<8x346xf32>
    %35 = tpu.matmul %33, %34, %cst_22 {dimension_numbers = #tpu.dot_dimension_numbers<[1], [0], [0], [1], [0, 0, 1, 1], [], []>} : vector<8x4xf32>, vector<4x346xf32>, vector<8x346xf32> -> vector<8x346xf32>
    %36 = arith.addf %31, %35 : vector<8x346xf32>
    %c7 = arith.constant 7 : index
    %c0_23 = arith.constant 0 : index
    %c0_24 = arith.constant 0 : index
    %37 = vector.load %arg1[%c7, %c0_23, %c0_24] : memref<9x8x4xf32, #tpu.memory_space<vmem>>, vector<1x8x4xf32>
    %38 = vector.shape_cast %37 : vector<1x8x4xf32> to vector<8x4xf32>
    %39 = vector.extract_strided_slice %0 {offsets = [0, 37], sizes = [4, 346], strides = [1, 1]} : vector<4x384xf32> to vector<4x346xf32>
    %cst_25 = arith.constant dense<0.000000e+00> : vector<8x346xf32>
    %40 = tpu.matmul %38, %39, %cst_25 {dimension_numbers = #tpu.dot_dimension_numbers<[1], [0], [0], [1], [0, 0, 1, 1], [], []>} : vector<8x4xf32>, vector<4x346xf32>, vector<8x346xf32> -> vector<8x346xf32>
    %41 = arith.addf %36, %40 : vector<8x346xf32>
    %c8 = arith.constant 8 : index
    %c0_26 = arith.constant 0 : index
    %c0_27 = arith.constant 0 : index
    %42 = vector.load %arg1[%c8, %c0_26, %c0_27] : memref<9x8x4xf32, #tpu.memory_space<vmem>>, vector<1x8x4xf32>
    %43 = vector.shape_cast %42 : vector<1x8x4xf32> to vector<8x4xf32>
    %44 = vector.extract_strided_slice %0 {offsets = [0, 38], sizes = [4, 346], strides = [1, 1]} : vector<4x384xf32> to vector<4x346xf32>
    %cst_28 = arith.constant dense<0.000000e+00> : vector<8x346xf32>
    %45 = tpu.matmul %43, %44, %cst_28 {dimension_numbers = #tpu.dot_dimension_numbers<[1], [0], [0], [1], [0, 0, 1, 1], [], []>} : vector<8x4xf32>, vector<4x346xf32>, vector<8x346xf32> -> vector<8x346xf32>
    %46 = arith.addf %41, %45 : vector<8x346xf32>
    %c0_29 = arith.constant 0 : index
    %c0_30 = arith.constant 0 : index
    %47 = vector.load %arg2[%c0_29, %c0_30] : memref<8x1xf32, #tpu.memory_space<vmem>>, vector<8x1xf32>
    %48 = vector.broadcast %47 : vector<8x1xf32> to vector<8x346xf32>
    %49 = arith.addf %46, %48 : vector<8x346xf32>
    %c0_31 = arith.constant 0 : index
    %c0_32 = arith.constant 0 : index
    %50 = vector.load %arg4[%c0_31, %c0_32] : memref<8x384xf32, #tpu.memory_space<vmem>>, vector<8x346xf32>
    tpu.vector_store %arg4[%c0_31, %c0_32], %49 {strides = array<i32>} : memref<8x384xf32, #tpu.memory_space<vmem>>, vector<8x346xf32>,
    %cst_33 = arith.constant 0.000000e+00 : f32
    %51 = vector.broadcast %cst_33 : f32 to vector<8x38xf32>
    %c0_34 = arith.constant 0 : index
    %c346 = arith.constant 346 : index
    %52 = vector.load %arg4[%c0_34, %c346] : memref<8x384xf32, #tpu.memory_space<vmem>>, vector<8x38xf32>
    tpu.vector_store %arg4[%c0_34, %c346], %51 {strides = array<i32>} : memref<8x384xf32, #tpu.memory_space<vmem>>, vector<8x38xf32>,
    return
  }
  func.func @transform_0(%arg0: i32) -> (i32, i32, i32) {
    %c0_i32 = arith.constant 0 : i32
    %c0_i32_0 = arith.constant 0 : i32
    %c0_i32_1 = arith.constant 0 : i32
    %c0_i32_2 = arith.constant 0 : i32
    return %c0_i32, %c0_i32_0, %c0_i32_1 : i32, i32, i32
  }
  func.func @transform_1(%arg0: i32) -> (i32, i32) {
    %c0_i32 = arith.constant 0 : i32
    %c0_i32_0 = arith.constant 0 : i32
    %c0_i32_1 = arith.constant 0 : i32
    return %c0_i32, %c0_i32_0 : i32, i32
  }
  func.func @transform_2(%arg0: i32) -> (i32, i32) {
    %c0_i32 = arith.constant 0 : i32
    %c0_i32_0 = arith.constant 0 : i32
    return %c0_i32, %arg0 : i32, i32
  }
  func.func @transform_3(%arg0: i32) -> (i32, i32) {
    %c0_i32 = arith.constant 0 : i32
    %c0_i32_0 = arith.constant 0 : i32
    return %c0_i32, %arg0 : i32, i32
  }
}

</mosaic_0001>

<bundles_post_ra>
// kernel: tpu_custom_call.1
= control target key start
LH: loop header
LB: loop body
LE: loop exit
PB: predicated region body
PF: predicated region fallthrough
CT: control target
= control target key end

     0   :  { %8 = vsyncpa [#allocation3], 0  ;;  %s1470_s0 = inlined_call_operand.vmem [shape: f32[9,8,4], index: 0, kind: input, shape index: {}]   ;;  %s1471_s1 = inlined_call_operand.vmem [shape: f32[8,1], index: 1, kind: input, shape index: {}]   ;;  %s1472_s2 = inlined_call_operand.vmem [shape: f32[4,768], index: 2, kind: input, shape index: {}]   ;;  %s1473_s3 = inlined_call_operand.hbm [shape: f32[8,768], index: 3, kind: output, shape index: {}]  }
   0x1   :  { %10 = vsyncpa [#allocation3 + $0x1], 0  ;;  %s1269_s12 = smov 0   ;;  %s1271_s13 = smov 0  }
   0x2   :  { %s1273_s14 = smov 0   ;;  %s1275_s15 = smov 0  }
   0x3 LB: > { %s1290_s16 = sadd.s32 4294967295, %s1237_s15   ;;  %s1053_s17 = sadd.s32 4294967294, %s1237_s15   ;;  %s1237_s15 = sphi %s1275_s15, %s1479_s15   ;;  %s1233_s14 = sphi %s1273_s14, %s1478_s14   ;;  %s1229_s13 = sphi %s1271_s13, %s1477_s13   ;;  %s1225_s12 = sphi %s1269_s12, %s1476_s12  }
   0x4   : > { %s1294_s18 = sadd.s32 1, %s1237_s15   ;;  %s91_s19 = sadd.s32 1, %s1233_s14 }
   0x5   : > { %s88_s20 = ssub.s32 %s1237_s15, %s1294_s18  ;;  %p101_p0 = scmp.ne.s32.totalorder %s1233_s14, %s1229_s13 }
   0x6   : > { %p89_p1 = scmp.eq.s32.totalorder %s88_s20, 0  ;;  %p102_p2 = scmp.eq.s32.totalorder %s1290_s16, 1 }
   0x7   : > { %p107_p3 = scmp.ne.s32.totalorder %s1229_s13, %s1225_s12  ;;  %p108_p4 = scmp.eq.s32.totalorder %s1053_s17, 1 }
   0x8   : > { %s1305_s21 = scalar_select %p89_p1, %s1233_s14, %s91_s19  }
   0x9   : > { %p1307_p5 = por %p102_p2, %p101_p0  ;;  %p1311_p6 = por %p108_p4, %p107_p3 }
   0xa   : > { %p1056_p7 = scmp.ge.s32.totalorder %s1237_s15, 1  ;;  %p141_p8 = scmp.lt.s32.totalorder %s1237_s15, 3 }
   0xc   : > { %p142_p9 = pnand %p1056_p7, %p141_p8 }
   0xd   : > { %s165_s24 = smul.u32 (!%p142_p9), 3, %s1290_s16  ;;  %s1239_s29 = smov (!%p142_p9), 127  }
   0xe   : > { %145 = sbr.rel (%p142_p9) target bundleno = 355 (0x163), region = 32  ;;  %s1240_s30 = smov (!%p142_p9), 126  }
   0xf   : > { %p166_p10 = scmp.lt.s32.totalorder (!%p142_p9), %s165_s24, 5  ;;  %s1241_s4 = smov (!%p142_p9), 110  }
  0x10   : > { %s1242_s5 = smov (!%p142_p9), 109   ;;  %s1243_s6 = smov (!%p142_p9), 108  }
  0x11   : > { %s1244_s7 = smov (!%p142_p9), 92   ;;  %s1245_s8 = smov (!%p142_p9), 91  }
  0x12   : > { %s1246_s9 = smov (!%p142_p9), 90   ;;  %s162_s17 = sand.u32 (!%p142_p9), 1, %s1229_s13  }
  0x13   : > { %s1481_s24 = smov (!%p166_p10, %s165_s24), 5  ;;  %vm198_vm0 = vcmask 1043456   ;;  %vm194_vm1 = vcmask 31744   ;;  %v174_v29 = vld [vmem:[%s1470_s0] sm:$0xff]  ;;  %vm191_vm2 = vcmask 1039360   ;;  %v1058_v31 = vld [vmem:[%s1470_s0 + $0x8] sm:$0xff] }
  0x14   : > { %s1057_s25 = sshll.u32 %s1481_s24, 2  ;;  %vm354_vm3 = vcmask 1031168   ;;  %v1071_v36 = vld [vmem:[%s1470_s0 + $0x10] sm:$0xff]  ;;  %vm443_vm4 = vcmask 900096   ;;  %v1078_v46 = vld [vmem:[%s1470_s0 + $0x18] sm:$0xff]  ;;  %vm532_vm5 = vcmask 891904  }
  0x15   : > { %s169_s28 = scalar_lea.vmem %s1472_s2, %s1057_s25  ;;  %v1085_v52 = vld [vmem:[%s1470_s0 + $0x20] sm:$0xff]  ;;  %v1247_v56 = vmov 0   ;;  %vm621_vm6 = vcmask 883712   ;;  %v1092_v59 = vld [vmem:[%s1470_s0 + $0x28] sm:$0xff]  ;;  %vm710_vm7 = vcmask 752640   ;;  %vm799_vm8 = vcmask 744448  }
  0x16   : > { %v173_v0 = vld [vmem:[%s169_s28 + $0x8] sm:$0xf]  ;;  %v1321_v1 = vld [vmem:[%s169_s28] sm:$0xff]  ;;  %1174 = vset.pattern.permute.xlu0 %v1247_v56  ;;  %vm888_vm9 = vcmask 736256   ;;  %s1124_s19 = smul.u32 24, %s162_s17  ;;  %vm975_vm10 = vcmask 1048272  }
  0x17   : > { %181 = vst [vmem:[#allocation1 + $0x10] ss:$2 sm:$0xff] %v173_v0  ;;  %v963_v55 = vld [vmem:[%s1471_s1] sm:$0xff]  ;;  %s1123_s20 = smul.u32 24, %s1290_s16 }
  0x18   : > { %179 = vst [vmem:[#allocation1] ss:$2 sm:$0xff] %v1321_v1  ;;  %s164_s24 = scalar_lea.vmem [#allocation2], %s1124_s19 }
  0x19   : > { %s989_s27 = scalar_lea.hbm %s1473_s3, %s1123_s20  ;;  %s991_s28 = sshll.u32 %s164_s24, 4  ;;  %s992_s28 = int_to_ptr.vmem [resolvable:$true] %s991_s28 }
  0x1a   : > { %s993_s16 = sshll.u32 %s989_s27, 4  ;;  %s994_s16 = int_to_ptr.hbm [resolvable:$true] %s993_s16 }
  0x1e   : > { %v184_v2 = vld.sshfl [vmem:[#allocation1 + $0x10] sm:$0xff pattern:$0x75316420] }
  0x1f   : > { %189 = vrot.lane.b32.xlu0 %v184_v2, %s1239_s29  ;;  %267 = vst [vmem:[#allocation1 + $0x10] ss:$2 sm:$0xff] %v173_v0  ;;  %v183_v3 = vld.sshfl [vmem:[#allocation1 + $0x8] sm:$0xff pattern:$0x75316420] }
  0x20   : > { %187 = vrot.lane.b32.xlu1 %v183_v3, %s1239_s29  ;;  %v182_v4 = vld.sshfl [vmem:[#allocation1] sm:$0xff pattern:$0x75316420] }
  0x21   : > { %265 = vst [vmem:[#allocation1] ss:$2 sm:$0xff] %v1321_v1 }
  0x26   : > { %v1325_v5 = vld.sshfl [vmem:[#allocation1 + $0x10] sm:$0xff pattern:$0x75316420] }
  0x27   : > { %185 = vrot.lane.b32.xlu0 %v182_v4, %s1239_s29  ;;  %344 = vst [vmem:[#allocation1 + $0x10] ss:$2 sm:$0xff] %v173_v0  ;;  %s978_s29 = scalar_lea.sflag [#allocation3], %s162_s17 }
  0x28   : > { %v1327_v6 = vld.sshfl [vmem:[#allocation1] sm:$0xff pattern:$0x75316420]  ;;  %v1329_v7 = vld.sshfl [vmem:[#allocation1 + $0x8] sm:$0xff pattern:$0x75316420] }
  0x29   : > { %342 = vst [vmem:[#allocation1] ss:$2 sm:$0xff] %v1321_v1  ;;  %1065 = vmatpush.msk.msra.mxu3 %vm198_vm0, %v1327_v6 }
  0x2a   : > { %1066 = vmatmul.msk.f32.vlgmr.msra.gmra.mxu3 %vm194_vm1, %v174_v29 }
  0x2e   : > { %v347_v8 = vld.sshfl [vmem:[#allocation1 + $0x10] sm:$0xff pattern:$0x75316420] }
  0x2f   : > { %433 = vst [vmem:[#allocation1 + $0x10] ss:$2 sm:$0xff] %v173_v0 }
  0x30   : > { %v345_v9 = vld.sshfl [vmem:[#allocation1] sm:$0xff pattern:$0x75316420]  ;;  %v346_v10 = vld.sshfl [vmem:[#allocation1 + $0x8] sm:$0xff pattern:$0x75316420] }
  0x31   : > { %348 = vrot.lane.b32.xlu1 %v345_v9, %s1240_s30  ;;  %350 = vrot.lane.b32.xlu2 %v346_v10, %s1240_s30  ;;  %431 = vst [vmem:[#allocation1] ss:$2 sm:$0xff] %v1321_v1 }
  0x36   : > { %v436_v11 = vld.sshfl [vmem:[#allocation1 + $0x10] sm:$0xff pattern:$0x75316420] }
  0x37   : > { %522 = vst [vmem:[#allocation1 + $0x10] ss:$2 sm:$0xff] %v173_v0 }
  0x38   : > { %v435_v12 = vld.sshfl [vmem:[#allocation1 + $0x8] sm:$0xff pattern:$0x75316420]  ;;  %v434_v13 = vld.sshfl [vmem:[#allocation1] sm:$0xff pattern:$0x75316420] }
  0x39   : > { %441 = vrot.lane.b32.xlu1 %v436_v11, %s1241_s4  ;;  %439 = vrot.lane.b32.xlu0 %v435_v12, %s1241_s4  ;;  %520 = vst [vmem:[#allocation1] ss:$2 sm:$0xff] %v1321_v1 }
  0x3a   : > { %352 = vrot.lane.b32.xlu2 %v347_v8, %s1240_s30  ;;  %s1189_s30 = sshra.s32 %s994_s16, 4  ;;  %s1190_s30 = int_to_ptr.hbm [resolvable:$true] %s1189_s30 }
  0x3b   : > { %p1196_p0 = scmp.lt.s32.totalorder %s1190_s30, %s1473_s3 }
  0x3e   : > { %v525_v14 = vld.sshfl [vmem:[#allocation1 + $0x10] sm:$0xff pattern:$0x75316420] }
  0x3f   : > { %611 = vst [vmem:[#allocation1 + $0x10] ss:$2 sm:$0xff] %v173_v0 }
  0x40   : > { %v524_v15 = vld.sshfl [vmem:[#allocation1 + $0x8] sm:$0xff pattern:$0x75316420]  ;;  %v523_v16 = vld.sshfl [vmem:[#allocation1] sm:$0xff pattern:$0x75316420] }
  0x41   : > { %530 = vrot.lane.b32.xlu0 %v525_v14, %s1242_s5  ;;  %528 = vrot.lane.b32.xlu1 %v524_v15, %s1242_s5  ;;  %609 = vst [vmem:[#allocation1] ss:$2 sm:$0xff] %v1321_v1 }
  0x42   : > { %437 = vrot.lane.b32.xlu2 %v434_v13, %s1241_s4  ;;  %v1113_v13 = vld [vmem:[%s1470_s0 + $0x40] sm:$0xff]  ;;  %s1191_s4 = scalar_lea.hbm %s1190_s30, 24 }
  0x43   : > { %p1192_p11 = scmp.ne.s32.totalorder %s1190_s30, %s1191_s4 }
  0x45   : > { %p1193_p12 = pnand %p1192_p11, %p1307_p5 }
  0x46   : > { %v614_v17 = vld.sshfl [vmem:[#allocation1 + $0x10] sm:$0xff pattern:$0x75316420] }
  0x47   : > { %700 = vst [vmem:[#allocation1 + $0x10] ss:$2 sm:$0xff] %v173_v0  ;;  %p1194_p13 = pneg %p1193_p12 }
  0x48   : > { %v612_v18 = vld.sshfl [vmem:[#allocation1] sm:$0xff pattern:$0x75316420]  ;;  %v613_v19 = vld.sshfl [vmem:[#allocation1 + $0x8] sm:$0xff pattern:$0x75316420] }
  0x49   : > { %526 = vrot.lane.b32.xlu0 %v523_v16, %s1242_s5  ;;  %615 = vrot.lane.b32.xlu1 %v612_v18, %s1243_s6  ;;  %698 = vst [vmem:[#allocation1] ss:$2 sm:$0xff] %v1321_v1 }
  0x4a   : > { %617 = vrot.lane.b32.xlu2 %v613_v19, %s1243_s6 }
  0x4e   : > { %v703_v20 = vld.sshfl [vmem:[#allocation1 + $0x10] sm:$0xff pattern:$0x75316420] }
  0x4f   : > { %789 = vst [vmem:[#allocation1 + $0x10] ss:$2 sm:$0xff] %v173_v0 }
  0x50   : > { %v702_v21 = vld.sshfl [vmem:[#allocation1 + $0x8] sm:$0xff pattern:$0x75316420]  ;;  %v701_v22 = vld.sshfl [vmem:[#allocation1] sm:$0xff pattern:$0x75316420] }
  0x51   : > { %708 = vrot.lane.b32.xlu1 %v703_v20, %s1244_s7  ;;  %706 = vrot.lane.b32.xlu0 %v702_v21, %s1244_s7  ;;  %787 = vst [vmem:[#allocation1] ss:$2 sm:$0xff] %v1321_v1 }
  0x52   : > { %704 = vrot.lane.b32.xlu2 %v701_v22, %s1244_s7  ;;  %s1195_s7 = scalar_lea.hbm %s1473_s3, 48 }
  0x53   : > { %p1197_p1 = scmp.lt.s32.totalorder %s1195_s7, %s1191_s4 }
  0x55   : > { %p1198_p2 = por %p1197_p1, %p1196_p0 }
  0x56   : > { %v792_v23 = vld.sshfl [vmem:[#allocation1 + $0x10] sm:$0xff pattern:$0x75316420] }
  0x57   : > { %878 = vst [vmem:[#allocation1 + $0x10] ss:$2 sm:$0xff] %v173_v0  ;;  %p1199_p3 = pnand %p1198_p2, %p1194_p13 }
  0x58   : > { %v791_v24 = vld.sshfl [vmem:[#allocation1 + $0x8] sm:$0xff pattern:$0x75316420]  ;;  %v790_v25 = vld.sshfl [vmem:[#allocation1] sm:$0xff pattern:$0x75316420] }
  0x59   : > { %797 = vrot.lane.b32.xlu1 %v792_v23, %s1245_s8  ;;  %795 = vrot.lane.b32.xlu0 %v791_v24, %s1245_s8  ;;  %876 = vst [vmem:[#allocation1] ss:$2 sm:$0xff] %v1321_v1  ;;  %v1099_v1 = vld [vmem:[%s1470_s0 + $0x30] sm:$0xff] }
  0x5a   : > { %619 = vrot.lane.b32.xlu2 %v614_v17, %s1243_s6 }
  0x5e   : > { %v881_v26 = vld.sshfl [vmem:[#allocation1 + $0x10] sm:$0xff pattern:$0x75316420] }
  0x60   : > { %v879_v27 = vld.sshfl [vmem:[#allocation1] sm:$0xff pattern:$0x75316420]  ;;  %v880_v28 = vld.sshfl [vmem:[#allocation1 + $0x8] sm:$0xff pattern:$0x75316420] }
  0x61   : > { %886 = vrot.lane.b32.xlu0 %v881_v26, %s1246_s9  ;;  %882 = vrot.lane.b32.xlu1 %v879_v27, %s1246_s9 }
  0x62   : > { %793 = vrot.lane.b32.xlu2 %v790_v25, %s1245_s8 }
  0x69   : > { %966 = vperm.xlu0 %1174, %v963_v55  }
  0x6a   : > { %884 = vrot.lane.b32.xlu2 %v880_v28, %s1246_s9 }
  0x8b   : > { %v351_v30 = vpop.permute.xlu2 %350 }
  0x91   : > { %v190_v32 = vpop.permute.xlu0 %189 }
  0x92   : > { %v188_v33 = vpop.permute.xlu1 %187  ;;  %1063 = vmatpush.msk.msra.mxu2 %vm198_vm0, %v190_v32 }
  0x93   : > { %v193_v34 = vsel %vm191_vm2, %v188_v33, %v190_v32  ;;  %1064 = vmatmul.msk.f32.vlgmr.msra.gmra.mxu2 %vm194_vm1, %v1058_v31 }
  0x94   : > { %v353_v35 = vpop.permute.xlu2 %352  ;;  %1061 = vmatpush.msk.msra.mxu1 %vm198_vm0, %v193_v34 }
  0x95   : > { %1062 = vmatmul.msk.f32.vlgmr.msra.gmra.mxu1 %vm194_vm1, %v1058_v31  ;;  %v356_v37 = vsel %vm354_vm3, %v351_v30, %v353_v35 }
  0x96   : > { %1074 = vmatpush.msk.msrb.mxu3 %vm198_vm0, %v356_v37  ;;  %1069 = vmatpush.msk.msrb.mxu1 %vm198_vm0, %v1325_v5 }
  0x97   : > { %1075 = vmatmul.msk.f32.vlgmr.msrb.gmra.mxu3 %vm194_vm1, %v1071_v36 }
  0x99   : > { %v186_v38 = vpop.permute.xlu0 %185 }
  0x9a   : > { %v192_v39 = vsel %vm191_vm2, %v186_v38, %v188_v33 }
  0x9b   : > { %1059 = vmatpush.msk.msra.mxu0 %vm198_vm0, %v192_v39 }
  0x9c   : > { %v438_v40 = vpop.permute.xlu2 %437  ;;  %1060 = vmatmul.msk.f32.vlgmr.msra.gmra.mxu0 %vm194_vm1, %v1058_v31 }
  0x9d   : > { %1070 = vmatmul.msk.f32.vlgmr.msrb.gmra.mxu1 %vm194_vm1, %v174_v29  ;;  %1067 = vmatpush.msk.msrb.mxu0 %vm198_vm0, %v1329_v7  ;;  %v1106_v7 = vld [vmem:[%s1470_s0 + $0x38] sm:$0xff] }
  0x9f   : > { %1076 = vmatpush.msk.msra.mxu0 %vm198_vm0, %v353_v35 }
  0xa3   : > { %v349_v41 = vpop.permute.xlu1 %348 }
  0xa4   : > { %v355_v42 = vsel %vm354_vm3, %v349_v41, %v351_v30  ;;  %v618_v43 = vpop.permute.xlu2 %617  ;;  %1068 = vmatmul.msk.f32.vlgmr.msrb.gmra.mxu0 %vm194_vm1, %v174_v29 }
  0xa5   : > { %1072 = vmatpush.msk.msrb.mxu2 %vm198_vm0, %v355_v42 }
  0xa6   : > { %1073 = vmatmul.msk.f32.vlgmr.msrb.gmra.mxu2 %vm194_vm1, %v1071_v36 }
  0xab   : > { %v442_v44 = vpop.permute.xlu1 %441  ;;  %v440_v45 = vpop.permute.xlu0 %439 }
  0xac   : > { %v444_v47 = vsel %vm443_vm4, %v438_v40, %v440_v45  ;;  %v445_v48 = vsel %vm443_vm4, %v440_v45, %v442_v44  ;;  %1083 = vmatpush.msk.msra.mxu3 %vm198_vm0, %v442_v44  ;;  %v705_v49 = vpop.permute.xlu2 %704  ;;  %1077 = vmatmul.msk.f32.vlgmr.msra.gmra.mxu0 %vm194_vm1, %v1071_v36 }
  0xad   : > { %1079 = vmatpush.msk.msra.mxu1 %vm198_vm0, %v444_v47  ;;  %1081 = vmatpush.msk.msra.mxu2 %vm198_vm0, %v445_v48  ;;  %v297_v20 = vpop.f32.mrf.mxu3 }
  0xae   : > { %1080 = vmatmul.msk.f32.vlgmr.msra.gmra.mxu1 %vm194_vm1, %v1078_v46  ;;  %1082 = vmatmul.msk.f32.vlgmr.msra.gmra.mxu2 %vm194_vm1, %v1078_v46 }
  0xaf   : > { %1084 = vmatmul.msk.f32.vlgmr.msra.gmra.mxu3 %vm194_vm1, %v1078_v46 }
  0xb3   : > { %v531_v50 = vpop.permute.xlu0 %530  ;;  %v529_v51 = vpop.permute.xlu1 %528 }
  0xb4   : > { %v534_v53 = vsel %vm532_vm5, %v529_v51, %v531_v50  ;;  %1090 = vmatpush.msk.msrb.mxu2 %vm198_vm0, %v531_v50  ;;  %v620_v54 = vpop.permute.xlu2 %619 }
  0xb5   : > { %1088 = vmatpush.msk.msrb.mxu1 %vm198_vm0, %v534_v53  ;;  %v623_v62 = vsel %vm621_vm6, %v618_v43, %v620_v54 }
  0xb6   : > { %1089 = vmatmul.msk.f32.vlgmr.msrb.gmra.mxu1 %vm194_vm1, %v1085_v52  ;;  %1091 = vmatmul.msk.f32.vlgmr.msrb.gmra.mxu2 %vm194_vm1, %v1085_v52 }
  0xb7   : > { %1097 = vmatpush.msk.msra.mxu1 %vm198_vm0, %v620_v54 }
  0xbb   : > { %v527_v57 = vpop.permute.xlu0 %526  ;;  %v616_v58 = vpop.permute.xlu1 %615 }
  0xbc   : > { %v533_v60 = vsel %vm532_vm5, %v527_v57, %v529_v51  ;;  %v622_v61 = vsel %vm621_vm6, %v616_v58, %v618_v43  ;;  %v794_v4 = vpop.permute.xlu2 %793 }
  0xbd   : > { %1086 = vmatpush.msk.msrb.mxu0 %vm198_vm0, %v533_v60  ;;  %1093 = vmatpush.msk.msrb.mxu3 %vm198_vm0, %v622_v61 }
  0xbe   : > { %1087 = vmatmul.msk.f32.vlgmr.msrb.gmra.mxu0 %vm194_vm1, %v1085_v52  ;;  %1094 = vmatmul.msk.f32.vlgmr.msrb.gmra.mxu3 %vm194_vm1, %v1092_v59 }
  0xbf   : > { %1095 = vmatpush.msk.msra.mxu0 %vm198_vm0, %v623_v62  ;;  %1098 = vmatmul.msk.f32.vlgmr.msra.gmra.mxu1 %vm194_vm1, %v1092_v59 }
  0xc3   : > { %v709_v63 = vpop.permute.xlu1 %708  ;;  %v707_v0 = vpop.permute.xlu0 %706 }
  0xc4   : > { %v711_v2 = vsel %vm710_vm7, %v705_v49, %v707_v0  ;;  %v712_v3 = vsel %vm710_vm7, %v707_v0, %v709_v63  ;;  %1104 = vmatpush.msk.msrb.mxu0 %vm198_vm0, %v709_v63  ;;  %v885_v10 = vpop.permute.xlu2 %884 }
  0xc5   : > { %1100 = vmatpush.msk.msra.mxu2 %vm198_vm0, %v711_v2  ;;  %1102 = vmatpush.msk.msra.mxu3 %vm198_vm0, %v712_v3 }
  0xc6   : > { %1096 = vmatmul.msk.f32.vlgmr.msra.gmra.mxu0 %vm194_vm1, %v1092_v59  ;;  %1101 = vmatmul.msk.f32.vlgmr.msra.gmra.mxu2 %vm194_vm1, %v1099_v1 }
  0xc7   : > { %1103 = vmatmul.msk.f32.vlgmr.msra.gmra.mxu3 %vm194_vm1, %v1099_v1 }
  0xcb   : > { %v798_v5 = vpop.permute.xlu1 %797  ;;  %v796_v6 = vpop.permute.xlu0 %795 }
  0xcc   : > { %v801_v8 = vsel %vm799_vm8, %v796_v6, %v798_v5  ;;  %v800_v9 = vsel %vm799_vm8, %v794_v4, %v796_v6  ;;  %1111 = vmatpush.msk.msrb.mxu3 %vm198_vm0, %v798_v5 }
  0xcd   : > { %1107 = vmatpush.msk.msrb.mxu1 %vm198_vm0, %v800_v9  ;;  %1109 = vmatpush.msk.msrb.mxu2 %vm198_vm0, %v801_v8 }
  0xce   : > { %1105 = vmatmul.msk.f32.vlgmr.msrb.gmra.mxu0 %vm194_vm1, %v1099_v1  ;;  %1108 = vmatmul.msk.f32.vlgmr.msrb.gmra.mxu1 %vm194_vm1, %v1106_v7 }
  0xcf   : > { %1110 = vmatmul.msk.f32.vlgmr.msrb.gmra.mxu2 %vm194_vm1, %v1106_v7  ;;  %1112 = vmatmul.msk.f32.vlgmr.msrb.gmra.mxu3 %vm194_vm1, %v1106_v7  ;;  %v1248_v7 = vmov 0.0  }
  0xd3   : > { %v887_v11 = vpop.permute.xlu0 %886  ;;  %v883_v12 = vpop.permute.xlu1 %882 }
  0xd4   : > { %v890_v14 = vsel %vm888_vm9, %v885_v10, %v887_v11  ;;  %v889_v15 = vsel %vm888_vm9, %v883_v12, %v885_v10  ;;  %1118 = vmatpush.msk.msra.mxu2 %vm198_vm0, %v887_v11 }
  0xd5   : > { %1114 = vmatpush.msk.msra.mxu0 %vm198_vm0, %v889_v15  ;;  %1116 = vmatpush.msk.msra.mxu1 %vm198_vm0, %v890_v14 }
  0xd6   : > { %1115 = vmatmul.msk.f32.vlgmr.msra.gmra.mxu0 %vm194_vm1, %v1113_v13  ;;  %1117 = vmatmul.msk.f32.vlgmr.msra.gmra.mxu1 %vm194_vm1, %v1113_v13 }
  0xd7   : > { %1119 = vmatmul.msk.f32.vlgmr.msra.gmra.mxu2 %vm194_vm1, %v1113_v13 }
  0xdb   : > { %v967_v56 = vpop.permute.xlu0 %966 }
 0x112   : > { %v242_v16 = vpop.f32.mrf.mxu1 }
 0x116   : > { %v262_v18 = vpop.f32.mrf.mxu2 }
 0x119   : > { %v222_v17 = vpop.f32.mrf.mxu0 }
 0x11a   : > { %v337_v19 = vpop.f32.mrf.mxu1  ;;  %v403_v24 = vpop.f32.mrf.mxu3  ;;  %v298_v30 = vadd.f32 %v297_v20, %v222_v17 }
 0x11b   : > { %v338_v39 = vadd.f32 %v337_v19, %v262_v18 }
 0x121   : > { %v317_v21 = vpop.f32.mrf.mxu0 }
 0x122   : > { %v318_v33 = vadd.f32 %v317_v21, %v242_v16 }
 0x124   : > { %v427_v37 = vadd.f32 %v403_v24, %v318_v33 }
 0x129   : > { %v383_v22 = vpop.f32.mrf.mxu2  ;;  %v423_v25 = vpop.f32.mrf.mxu0 }
 0x12a   : > { %v426_v36 = vadd.f32 %v383_v22, %v298_v30  ;;  %v428_v47 = vadd.f32 %v423_v25, %v338_v39 }
 0x12b   : > { %v472_v23 = vpop.f32.mrf.mxu1 }
 0x12c   : > { %v515_v38 = vadd.f32 %v472_v23, %v426_v36 }
 0x131   : > { %v492_v26 = vpop.f32.mrf.mxu2 }
 0x132   : > { %v512_v28 = vpop.f32.mrf.mxu3  ;;  %v516_v40 = vadd.f32 %v492_v26, %v427_v37 }
 0x133   : > { %v581_v27 = vpop.f32.mrf.mxu1  ;;  %v517_v50 = vadd.f32 %v512_v28, %v428_v47 }
 0x134   : > { %v605_v48 = vadd.f32 %v581_v27, %v516_v40 }
 0x139   : > { %v601_v31 = vpop.f32.mrf.mxu2 }
 0x13a   : > { %v606_v52 = vadd.f32 %v601_v31, %v517_v50 }
 0x13b   : > { %v561_v29 = vpop.f32.mrf.mxu0 }
 0x13c   : > { %v690_v34 = vpop.f32.mrf.mxu1  ;;  %v604_v42 = vadd.f32 %v561_v29, %v515_v38 }
 0x13d   : > { %v695_v61 = vadd.f32 %v690_v34, %v606_v52 }
 0x141   : > { %v650_v32 = vpop.f32.mrf.mxu3 }
 0x142   : > { %v693_v45 = vadd.f32 %v650_v32, %v604_v42 }
 0x143   : > { %v670_v35 = vpop.f32.mrf.mxu0 }
 0x144   : > { %v694_v51 = vadd.f32 %v670_v35, %v605_v48 }
 0x149   : > { %v739_v41 = vpop.f32.mrf.mxu2 }
 0x14a   : > { %v759_v46 = vpop.f32.mrf.mxu3  ;;  %v782_v49 = vadd.f32 %v739_v41, %v693_v45 }
 0x14b   : > { %v779_v43 = vpop.f32.mrf.mxu0  ;;  %v828_v44 = vpop.f32.mrf.mxu1  ;;  %v783_v53 = vadd.f32 %v759_v46, %v694_v51 }
 0x14c   : > { %v871_v54 = vadd.f32 %v828_v44, %v782_v49  ;;  %v784_v1 = vadd.f32 %v779_v43, %v695_v61 }
 0x152   : > { %v848_v55 = vpop.f32.mrf.mxu2  ;;  %v868_v63 = vpop.f32.mrf.mxu3 }
 0x153   : > { %v872_v57 = vadd.f32 %v848_v55, %v783_v53  ;;  %v917_v58 = vpop.f32.mrf.mxu0  ;;  %v937_v59 = vpop.f32.mrf.mxu1  ;;  %v873_v3 = vadd.f32 %v868_v63, %v784_v1 }
 0x154   : > { %v960_v60 = vadd.f32 %v917_v58, %v871_v54 }
 0x155   : > { %v961_v62 = vadd.f32 %v937_v59, %v872_v57 }
 0x156   : > { %v969_v0 = vadd.f32 %v967_v56, %v960_v60 }
 0x157   : > { %v970_v2 = vadd.f32 %v967_v56, %v961_v62 }
 0x158   : > { %972 = vst [vmem:[%s164_s24] sm:$0xff] %v969_v0 }
 0x159   : > { %973 = vst [vmem:[%s164_s24 + $0x8] sm:$0xff] %v970_v2 }
 0x15a   : > { %v957_v4 = vpop.f32.mrf.mxu2 }
 0x15b   : > { %v962_v5 = vadd.f32 %v957_v4, %v873_v3 }
 0x15d   : > { %v971_v6 = vadd.f32 %v967_v56, %v962_v5 }
 0x15f   : > { %974 = vst.msk [vmem:[%s164_s24 + $0x10] sm:$0xff] %vm888_vm9, %v971_v6 }
 0x160   : > { %976 = vst.msk [vmem:[%s164_s24 + $0x10] sm:$0xff] %vm975_vm10, %v1248_v7 }
 0x161   : > { %1202 = shalt.err (!%p1199_p3)
}
 0x162   : > { %1125 = dma.vmem_to_hbm [thread:$0]  (%p1307_p5), %s992_s28, 384, %s994_s16, %s978_s29  }
 0x163 PF: > { %p1131_p4 = scmp.ge.s32.totalorder %s1237_s15, 2  ;;  %s1005_s10 = sand.u32 1, %s1225_s12  }
 0x164   : > { %s1006_s11 = scalar_lea.sflag [#allocation3], %s1005_s10 }
 0x165   : > { %p1128_p7 = pnand %p1131_p4, %p1311_p6 }
 0x167   : > { %p1129_p8 = pneg %p1128_p7 }
 0x169   : > { %1220 = dma.done.wait (%p1129_p8), %s1006_s11, 384  }
 0x16a   : > { %1222 = vsyncadd (%p1129_p8), %s1006_s11, 4294966912  ;;  %p13_p9 = scmp.ge.s32.totalorder %s1294_s18, 4   ;;  %s1476_s12 = smov %s1229_s13 }
 0x16b   : > { %s1477_s13 = smov %s1233_s14  ;;  %s1478_s14 = smov %s1305_s21 }
 0x16c   : > { %s1479_s15 = smov %s1294_s18  ;;  %15 = sbr.rel (!%p13_p9) target bundleno = 3 (0x3), region = 84 }
 0x171   :  { %1012 = vsyncpa [#allocation3], 1 }
 0x172   :  { %1014 = vsyncpa [#allocation3 + $0x1], 1 }

</bundles_post_ra>
